<compile_context>
chip_gen: v6e
topology: v6e:2x2x1
jax: 0.10.0
libtpu: 0.0.40
codegen_flags: <defaults>
</compile_context>

<pallas_src>
import jax
import jax.numpy as jnp
from jax.experimental import pallas as pl
from jax.experimental.pallas import tpu as pltpu


def iieub_kernel(x_ref, xpre_ref, p_ref, o_ref):
    # x_ref:    (Bt, C,   T)   conv output tile
    # xpre_ref: (Bt, Cin, T)   (effective) conv input tile
    # p_ref:    (Bt, C,   3)   packed per-channel params [shift-bound, flen, bound]
    # o_ref:    (Bt, C,   T)
    eps = 1e-8

    x = x_ref[...].astype(jnp.float32)          # (Bt, C, T)
    xpre = xpre_ref[...].astype(jnp.float32)    # (Bt, Cin, T)
    p = p_ref[...].astype(jnp.float32)          # (Bt, C, 3)

    shift_m_bound = p[:, :, 0:1]                # shift - bound   (Bt, C, 1)
    flen = p[:, :, 1:2]                         # filter_len*coe  (Bt, C, 1)
    bound = p[:, :, 2:3]                        # bound           (Bt, C, 1)

    # x_pre_vec_len = 1 / (||x_pre||_2 over channels + eps)  -> (Bt, 1, T)
    xpl = 1.0 / (jnp.sqrt(jnp.sum(xpre * xpre, axis=1, keepdims=True)) + eps)

    # mask = -bound + shift + filter_len * x * x_pre_vec_len
    mask = shift_m_bound + flen * x * xpl       # (Bt, C, T)
    bx = bound * x
    neg = bx * jnp.exp(jnp.minimum(mask, 0.0))  # exp -> EUP (free slot)
    pos = bx + mask * x
    o_ref[...] = jnp.where(mask < 0.0, neg, pos).astype(o_ref.dtype)


def _choose_tiles(B, C, Cin, HWp, itemsize, vmem_budget_bytes=8 << 20):
    """Pick (Bt, T): batch block and lane tile (T | HWp, T multiple of 128)."""
    # Double-buffered bytes per lane column of one batch row:
    # x + out (C each) plus x_pre (Cin).
    per_lane = 2 * (2 * C + Cin) * itemsize
    cap = max(128, min(HWp, 2048))
    cap = (cap // 128) * 128
    t = cap
    while t > 128 and (HWp % t != 0 or t * per_lane > vmem_budget_bytes):
        t -= 128
    bt = 1
    if t == HWp:
        # Whole spatial extent in one tile: merge batch elements per step to
        # amortize per-grid-step overhead (Bt must divide B -> no edge blocks).
        per_b = 2 * (2 * C + Cin) * HWp * itemsize
        bt = int(max(1, min(B, vmem_budget_bytes // max(1, per_b))))
        while B % bt:
            bt -= 1
    return bt, t


def iieub_forward(x, x_pre, weight, gamma, beta, bound,
                  kernel_size=(1, 1), stride=(1, 1), padding=(0, 0)):
    """x: (B, C, H, W) conv output; x_pre: (B, Cin, Hin, Win) conv input;
    weight: (C, Cin, kh, kw); gamma/beta/bound: (C,)."""
    eps = 1e-8
    ln_eps = 1e-6
    B, C, H, W = x.shape
    HW = H * W

    # --- x_pre preprocessing (cheap XLA glue) matching the module's branches --
    coe_k = 1.0
    if kernel_size[0] > 1:
        coe_k = 1.0 / kernel_size[0]
        sq = jnp.sum(jnp.square(x_pre.astype(jnp.float32)), axis=1, keepdims=True)
        pooled = jax.lax.reduce_window(
            sq, 0.0, jax.lax.add,
            window_dimensions=(1, 1, kernel_size[0], kernel_size[1]),
            window_strides=(1, 1, stride[0], stride[1]),
            padding=((0, 0), (0, 0),
                     (padding[0], padding[0]), (padding[1], padding[1])),
        ) / float(kernel_size[0] * kernel_size[1])
        x_pre_eff = jnp.sqrt(pooled)                     # (B, 1, H, W)
    elif stride[0] > 1:
        # AvgPool2d(kernel=1, stride=s) is a strided subsample.
        x_pre_eff = x_pre[:, :, ::stride[0], ::stride[1]]
    else:
        x_pre_eff = x_pre

    if x_pre_eff.shape[0] != B or x_pre_eff.shape[2:] != (H, W):
        raise ValueError("x_pre (after pooling/striding) must match x's batch "
                         "and spatial dims: got %s vs %s"
                         % (x_pre_eff.shape, x.shape))
    Cin = x_pre_eff.shape[1]

    x2 = x.reshape(B, C, HW)
    xp2 = x_pre_eff.reshape(B, Cin, HW)

    # --- Hoisted (tiny) computations, done once in XLA -----------------------
    # filter_len = coe_k / (||W_c||_2 + eps) per output channel       -> (C,)
    w2 = weight.reshape(C, -1).astype(jnp.float32)
    flen = coe_k / (jnp.sqrt(jnp.sum(w2 * w2, axis=1)) + eps)

    # shift = sigmoid(LayerNorm_C(global_avg_pool(x)))                -> (B, C)
    s = jnp.mean(x2.astype(jnp.float32), axis=2)
    mu = jnp.mean(s, axis=1, keepdims=True)
    var = jnp.mean(jnp.square(s - mu), axis=1, keepdims=True)
    s_hat = (s - mu) * jax.lax.rsqrt(var + ln_eps)
    shift = jax.nn.sigmoid(s_hat * gamma.reshape(1, C) + beta.reshape(1, C))

    # Packed per-channel params: (B, C, 3) = [shift - bound, flen, bound]
    bnd = bound.reshape(1, C).astype(jnp.float32)
    params = jnp.stack(
        [shift - bnd,
         jnp.broadcast_to(flen.reshape(1, C), (B, C)),
         jnp.broadcast_to(bnd, (B, C))],
        axis=-1,
    ).astype(jnp.float32)

    # --- Pad HW to a multiple of 128 for lane-dense blocks -------------------
    HWp = ((HW + 127) // 128) * 128
    if HWp != HW:
        pad = ((0, 0), (0, 0), (0, HWp - HW))
        x2 = jnp.pad(x2, pad)
        xp2 = jnp.pad(xp2, pad)

    Bt, T = _choose_tiles(B, C, Cin, HWp, jnp.dtype(x.dtype).itemsize)
    grid = (pl.cdiv(B, Bt), pl.cdiv(HWp, T))

    out = pl.pallas_call(
        iieub_kernel,
        out_shape=jax.ShapeDtypeStruct((B, C, HWp), x.dtype),
        grid_spec=pltpu.PrefetchScalarGridSpec(
            num_scalar_prefetch=0,
            grid=grid,
            in_specs=[
                pl.BlockSpec((Bt, C, T), lambda b, t: (b, 0, t)),
                pl.BlockSpec((Bt, Cin, T), lambda b, t: (b, 0, t)),
                pl.BlockSpec((Bt, C, 3), lambda b, t: (b, 0, 0)),
            ],
            out_specs=pl.BlockSpec((Bt, C, T), lambda b, t: (b, 0, t)),
        ),
        compiler_params=pltpu.CompilerParams(
            dimension_semantics=("parallel", "parallel")),
    )(x2, xp2, params)

    if HWp != HW:
        out = out[:, :, :HW]
    return out.reshape(B, C, H, W)


def iieub_reference(x, x_pre, weight, gamma, beta, bound,
                    kernel_size=(1, 1), stride=(1, 1), padding=(0, 0)):
    """Pure-JAX reference of the PyTorch forward (all three branches)."""
    eps = 1e-8
    B, C, H, W = x.shape
    if kernel_size[0] > 1:
        coe_k = 1.0 / kernel_size[0]
        sq = jnp.sum(jnp.square(x_pre), axis=1, keepdims=True)
        pooled = jax.lax.reduce_window(
            sq, 0.0, jax.lax.add,
            (1, 1, kernel_size[0], kernel_size[1]),
            (1, 1, stride[0], stride[1]),
            ((0, 0), (0, 0), (padding[0], padding[0]), (padding[1], padding[1])),
        ) / float(kernel_size[0] * kernel_size[1])
        xpl = coe_k / (jnp.sqrt(pooled) + eps)
    elif stride[0] > 1:
        xps = x_pre[:, :, ::stride[0], ::stride[1]]
        xpl = 1.0 / (jnp.linalg.norm(xps, axis=1, keepdims=True) + eps)
    else:
        xpl = 1.0 / (jnp.linalg.norm(x_pre, axis=1, keepdims=True) + eps)
    flen = 1.0 / (jnp.linalg.norm(weight.reshape(C, -1), axis=1) + eps)
    flen = flen.reshape(1, C, 1, 1)
    s = jnp.mean(x, axis=(2, 3))                      # (B, C)
    mu = jnp.mean(s, axis=-1, keepdims=True)
    var = jnp.mean((s - mu) ** 2, axis=-1, keepdims=True)
    s_hat = (s - mu) / jnp.sqrt(var + 1e-6) * gamma + beta
    shift = jax.nn.sigmoid(s_hat)[:, :, None, None]
    bnd = bound.reshape(1, C, 1, 1)
    mask = -bnd + shift + flen * x * xpl
    return jnp.where(mask < 0,
                     bnd * x * jnp.exp(jnp.minimum(mask, 0.0)),
                     bnd * x + mask * x)


if __name__ == "__main__":
    # Small shapes consistent with the module: inplanes=8, planes=16, 16x16.
    B, Cin, C, H, W = 2, 8, 16, 16, 16

    key = jax.random.PRNGKey(0)
    k1, k2 = jax.random.split(key)
    x_pre = jax.random.normal(k1, (B, Cin, H, W), dtype=jnp.float32)
    weight = 0.1 * jax.random.normal(k2, (C, Cin, 1, 1), dtype=jnp.float32)

    # x = Filt(x_pre): 1x1 conv (glue, plain JAX - x is an input to the module)
    x = jnp.einsum("oi,bihw->bohw", weight[:, :, 0, 0], x_pre)

    # Deterministic parameter init per module __init__.
    gamma = 0.01 * jnp.ones((C,), dtype=jnp.float32)   # norm.weight
    beta = jnp.zeros((C,), dtype=jnp.float32)          # norm.bias
    bound = 0.05 * jnp.ones((C,), dtype=jnp.float32)   # self.bound

    # --- main branch: kernel_size=(1,1), stride=(1,1) -------------------------
    out = jax.block_until_ready(
        iieub_forward(x, x_pre, weight, gamma, beta, bound))
    ref = iieub_reference(x, x_pre, weight, gamma, beta, bound)
    assert out.shape == (B, C, H, W)
    assert jnp.allclose(out, ref, rtol=1e-4, atol=1e-4)

    # --- pooled branch: kernel_size=(2,2), stride=(2,2) ------------------------
    ks, st, pd = (2, 2), (2, 2), (0, 0)
    w2 = 0.1 * jax.random.normal(jax.random.PRNGKey(1), (C, Cin, 2, 2),
                                 dtype=jnp.float32)
    x_s = jax.lax.conv_general_dilated(
        x_pre, w2, window_strides=st, padding=((0, 0), (0, 0)),
        dimension_numbers=("NCHW", "OIHW", "NCHW"))
    out2 = jax.block_until_ready(
        iieub_forward(x_s, x_pre, w2, gamma, beta, bound,
                      kernel_size=ks, stride=st, padding=pd))
    ref2 = iieub_reference(x_s, x_pre, w2, gamma, beta, bound,
                           kernel_size=ks, stride=st, padding=pd)
    assert out2.shape == x_s.shape
    assert jnp.allclose(out2, ref2, rtol=1e-4, atol=1e-4)

    print("KERNEL_OK")
</pallas_src>

<mosaic_0001>
module attributes {stable_mosaic.version = 11 : i64} {
  func.func @iieub_kernel(%arg0: i32, %arg1: i32, %arg2: memref<2x16x256xf32, #tpu.memory_space<vmem>>, %arg3: memref<2x8x256xf32, #tpu.memory_space<vmem>>, %arg4: memref<2x16x3xf32, #tpu.memory_space<vmem>>, %arg5: memref<2x16x256xf32, #tpu.memory_space<vmem>>) attributes {dimension_semantics = [#tpu.dimension_semantics<parallel>, #tpu.dimension_semantics<parallel>], iteration_bounds = array<i64: 1, 1>, scalar_prefetch = 0 : i64, scratch_operands = 0 : i64, tpu.core_type = #tpu.core_type<tc>, window_params = [{transform_indices = @transform_0, window_bounds = array<i64: 2, 16, 256>}, {transform_indices = @transform_1, window_bounds = array<i64: 2, 8, 256>}, {transform_indices = @transform_2, window_bounds = array<i64: 2, 16, 3>}, {transform_indices = @transform_3, window_bounds = array<i64: 2, 16, 256>}]} {
    %c0 = arith.constant 0 : index
    %c0_0 = arith.constant 0 : index
    %c0_1 = arith.constant 0 : index
    %0 = vector.load %arg2[%c0, %c0_0, %c0_1] : memref<2x16x256xf32, #tpu.memory_space<vmem>>, vector<2x16x256xf32>
    %c0_2 = arith.constant 0 : index
    %c0_3 = arith.constant 0 : index
    %c0_4 = arith.constant 0 : index
    %1 = vector.load %arg3[%c0_2, %c0_3, %c0_4] : memref<2x8x256xf32, #tpu.memory_space<vmem>>, vector<2x8x256xf32>
    %c0_5 = arith.constant 0 : index
    %c0_6 = arith.constant 0 : index
    %c0_7 = arith.constant 0 : index
    %2 = vector.load %arg4[%c0_5, %c0_6, %c0_7] : memref<2x16x3xf32, #tpu.memory_space<vmem>>, vector<2x16x3xf32>
    %3 = vector.extract_strided_slice %2 {offsets = [0, 0, 0], sizes = [2, 16, 1], strides = [1, 1, 1]} : vector<2x16x3xf32> to vector<2x16x1xf32>
    %4 = vector.extract_strided_slice %2 {offsets = [0, 0, 1], sizes = [2, 16, 1], strides = [1, 1, 1]} : vector<2x16x3xf32> to vector<2x16x1xf32>
    %5 = vector.extract_strided_slice %2 {offsets = [0, 0, 2], sizes = [2, 16, 1], strides = [1, 1, 1]} : vector<2x16x3xf32> to vector<2x16x1xf32>
    %6 = arith.mulf %1, %1 : vector<2x8x256xf32>
    %cst = arith.constant dense<0.000000e+00> : vector<2x256xf32>
    %7 = vector.multi_reduction <add>, %6, %cst [1] : vector<2x8x256xf32> to vector<2x256xf32>
    %8 = vector.shape_cast %7 : vector<2x256xf32> to vector<2x1x256xf32>
    %9 = math.sqrt %8 : vector<2x1x256xf32>
    %cst_8 = arith.constant 9.99999993E-9 : f32
    %10 = vector.broadcast %cst_8 : f32 to vector<2x1x256xf32>
    %11 = arith.addf %9, %10 : vector<2x1x256xf32>
    %cst_9 = arith.constant 1.000000e+00 : f32
    %12 = vector.broadcast %cst_9 : f32 to vector<2x1x256xf32>
    %13 = arith.divf %12, %11 : vector<2x1x256xf32>
    %14 = vector.broadcast %4 : vector<2x16x1xf32> to vector<2x16x256xf32>
    %15 = arith.mulf %14, %0 : vector<2x16x256xf32>
    %16 = vector.broadcast %13 : vector<2x1x256xf32> to vector<2x16x256xf32>
    %17 = arith.mulf %15, %16 : vector<2x16x256xf32>
    %18 = vector.broadcast %3 : vector<2x16x1xf32> to vector<2x16x256xf32>
    %19 = arith.addf %18, %17 : vector<2x16x256xf32>
    %20 = vector.broadcast %5 : vector<2x16x1xf32> to vector<2x16x256xf32>
    %21 = arith.mulf %20, %0 : vector<2x16x256xf32>
    %cst_10 = arith.constant 0.000000e+00 : f32
    %22 = vector.broadcast %cst_10 : f32 to vector<2x16x256xf32>
    %23 = arith.minimumf %19, %22 : vector<2x16x256xf32>
    %24 = math.exp %23 : vector<2x16x256xf32>
    %25 = arith.mulf %21, %24 : vector<2x16x256xf32>
    %26 = arith.mulf %19, %0 : vector<2x16x256xf32>
    %27 = arith.addf %21, %26 : vector<2x16x256xf32>
    %cst_11 = arith.constant 0.000000e+00 : f32
    %28 = vector.broadcast %cst_11 : f32 to vector<2x16x256xf32>
    %29 = arith.cmpf olt, %19, %28 : vector<2x16x256xf32>
    %30 = arith.select %29, %25, %27 : vector<2x16x256xi1>, vector<2x16x256xf32>
    %c0_12 = arith.constant 0 : index
    %c0_13 = arith.constant 0 : index
    %c0_14 = arith.constant 0 : index
    %31 = vector.load %arg5[%c0_12, %c0_13, %c0_14] : memref<2x16x256xf32, #tpu.memory_space<vmem>>, vector<2x16x256xf32>
    tpu.vector_store %arg5[%c0_12, %c0_13, %c0_14], %30 {strides = array<i32>} : memref<2x16x256xf32, #tpu.memory_space<vmem>>, vector<2x16x256xf32>,
    return
  }
  func.func @transform_0(%arg0: i32, %arg1: i32) -> (i32, i32, i32) {
    %c0_i32 = arith.constant 0 : i32
    %c0_i32_0 = arith.constant 0 : i32
    return %arg0, %c0_i32, %arg1 : i32, i32, i32
  }
  func.func @transform_1(%arg0: i32, %arg1: i32) -> (i32, i32, i32) {
    %c0_i32 = arith.constant 0 : i32
    %c0_i32_0 = arith.constant 0 : i32
    return %arg0, %c0_i32, %arg1 : i32, i32, i32
  }
  func.func @transform_2(%arg0: i32, %arg1: i32) -> (i32, i32, i32) {
    %c0_i32 = arith.constant 0 : i32
    %c0_i32_0 = arith.constant 0 : i32
    %c0_i32_1 = arith.constant 0 : i32
    return %arg0, %c0_i32, %c0_i32_0 : i32, i32, i32
  }
  func.func @transform_3(%arg0: i32, %arg1: i32) -> (i32, i32, i32) {
    %c0_i32 = arith.constant 0 : i32
    %c0_i32_0 = arith.constant 0 : i32
    return %arg0, %c0_i32, %arg1 : i32, i32, i32
  }
}

</mosaic_0001>

<bundles_post_ra>
// kernel: tpu_custom_call.1
= control target key start
LH: loop header
LB: loop body
LE: loop exit
PB: predicated region body
PF: predicated region fallthrough
CT: control target
= control target key end

     0   :  { %8 = vsyncpa [#allocation3], 0  ;;  %s528_s0 = inlined_call_operand.hbm [shape: f32[2,16,256], index: 0, kind: input, shape index: {}]   ;;  %s529_s1 = inlined_call_operand.vmem [shape: f32[2,8,256], index: 1, kind: input, shape index: {}]   ;;  %s530_s2 = inlined_call_operand.vmem [shape: f32[2,16,3], index: 2, kind: input, shape index: {}]   ;;  %s531_s3 = inlined_call_operand.hbm [shape: f32[2,16,256], index: 3, kind: output, shape index: {}]  }
   0x1   :  { %9 = vsyncpa [#allocation4], 0  ;;  %s375_s12 = smov [#allocation2]  }
   0x2   :  { %s15_s13 = sshll.u32 %s375_s12, 4  ;;  %s16_s13 = int_to_ptr.vmem [resolvable:$true] %s15_s13 }
   0x3   :  { %s339_s14 = scalar_lea.vmem %s16_s13, 1024  ;;  %p344_p1 = scmp.lt.s32.totalorder %s16_s13, %s16_s13 }
   0x4   :  { %p340_p0 = scmp.ne.s32.totalorder %s16_s13, %s339_s14  ;;  %p345_p2 = scmp.lt.s32.totalorder %s339_s14, %s339_s14 }
   0x6   :  { %p346_p3 = por %p345_p2, %p344_p1 }
   0x8   :  { %p347_p4 = pnand %p346_p3, %p340_p0 }
   0xa   :  { %350 = shalt.err (!%p347_p4)
}
   0xb   :  { %s376_s15 = smov 256   ;;  %s377_s16 = smov 16  }
   0xc   :  { %21 = dma.hbm_to_vmem [thread:$0]  %s528_s0, 1024, %s16_s13, [#allocation3], %s376_s15, %s376_s15, %s377_s16  }
   0xd   :  { %371 = dma.done.wait [#allocation3], 1024  }
   0xe   :  { %372 = vsyncadd [#allocation3], 4294966272  ;;  %v378_v0 = vmov 1   ;;  %v43_v1 = vld [vmem:[%s530_s2 + $0x10] sm:$0xff]  ;;  %v41_v2 = vld [vmem:[%s530_s2] sm:$0xff]  ;;  %v379_v5 = vmov 0  }
   0xf   :  { %294 = vset.pattern.permute.xlu1 %v378_v0  ;;  %293 = vset.pattern.permute.xlu0 %v378_v0  ;;  %v44_v3 = vld [vmem:[%s530_s2 + $0x18] sm:$0xff]  ;;  %v42_v4 = vld [vmem:[%s530_s2 + $0x8] sm:$0xff]  ;;  %v380_v6 = vmov 2   ;;  %v37_v7 = vld [vmem:[%s529_s1] sm:$0xff] }
  0x10   :  { %125 = vperm.xlu1 %294, %v43_v1   ;;  %115 = vperm.xlu0 %293, %v41_v2   ;;  %v38_v8 = vld [vmem:[%s529_s1 + $0x8] sm:$0xff]  ;;  %v45_v9 = vmul.f32 %v37_v7, %v37_v7  ;;  %v39_v11 = vld [vmem:[%s529_s1 + $0x10] sm:$0xff]  ;;  %v40_v12 = vld [vmem:[%s529_s1 + $0x18] sm:$0xff]  ;;  %s381_s1 = smov [#allocation5]  }
  0x11   :  { %v46_v10 = vmul.f32 %v38_v8, %v38_v8  ;;  %v47_v14 = vmul.f32 %v39_v11, %v39_v11  ;;  %v48_v16 = vmul.f32 %v40_v12, %v40_v12  ;;  %v442_v11 = vld [vmem:[#allocation2 + $0x20] sm:$0xff]  ;;  %v444_v12 = vld [vmem:[#allocation2 + $0x28] sm:$0xff]  ;;  %s274_s6 = sshll.u32 %s381_s1, 4  ;;  %s275_s6 = int_to_ptr.vmem [resolvable:$true] %s274_s6 }
  0x12   :  { %v49_v13 = vrot.slane %v45_v9, 4  ;;  %s351_s7 = scalar_lea.vmem %s275_s6, 1024  ;;  %p356_p6 = scmp.lt.s32.totalorder %s275_s6, %s275_s6 }
  0x13   :  { %v55_v15 = vrot.slane %v46_v10, 4  ;;  %v61_v18 = vrot.slane %v47_v14, 4  ;;  %v67_v20 = vrot.slane %v48_v16, 4  ;;  %p352_p5 = scmp.ne.s32.totalorder %s275_s6, %s351_s7  ;;  %p357_p7 = scmp.lt.s32.totalorder %s351_s7, %s351_s7 }
  0x14   :  { %130 = vperm.xlu1 %294, %v44_v3   ;;  %120 = vperm.xlu0 %293, %v42_v4   ;;  %v50_v17 = vadd.f32 %v49_v13, %v45_v9 }
  0x15   :  { %v56_v19 = vadd.f32 %v55_v15, %v46_v10  ;;  %v62_v22 = vadd.f32 %v61_v18, %v47_v14  ;;  %v68_v24 = vadd.f32 %v67_v20, %v48_v16  ;;  %v448_v15 = vld [vmem:[#allocation2 + $0x30] sm:$0xff]  ;;  %v450_v16 = vld [vmem:[#allocation2 + $0x38] sm:$0xff]  ;;  %p358_p8 = por %p357_p7, %p356_p6 }
  0x16   :  { %v51_v21 = vrot.slane %v50_v17, 2 }
  0x17   :  { %v57_v23 = vrot.slane %v56_v19, 2  ;;  %v63_v26 = vrot.slane %v62_v22, 2  ;;  %v69_v28 = vrot.slane %v68_v24, 2  ;;  %p359_p9 = pnand %p358_p8, %p352_p5 }
  0x18   :  { %296 = vset.pattern.permute.xlu1 %v379_v5  ;;  %295 = vset.pattern.permute.xlu0 %v379_v5  ;;  %v52_v25 = vadd.f32 %v51_v21, %v50_v17 }
  0x19   :  { %154 = vperm.xlu1 %296, %v42_v4   ;;  %150 = vperm.xlu0 %295, %v41_v2   ;;  %v58_v27 = vadd.f32 %v57_v23, %v56_v19  ;;  %v64_v30 = vadd.f32 %v63_v26, %v62_v22  ;;  %v70_v32 = vadd.f32 %v69_v28, %v68_v24 }
  0x1a   :  { %v53_v29 = vrot.slane %v52_v25, 1 }
  0x1b   :  { %v59_v31 = vrot.slane %v58_v27, 1  ;;  %v65_v34 = vrot.slane %v64_v30, 1  ;;  %v71_v36 = vrot.slane %v70_v32, 1 }
  0x1c   :  { %v54_v33 = vadd.f32 %v53_v29, %v52_v25 }
  0x1d   :  { %158 = vperm.xlu1 %296, %v43_v1   ;;  %162 = vperm.xlu0 %295, %v44_v3   ;;  %v60_v35 = vadd.f32 %v59_v31, %v58_v27  ;;  %v66_v37 = vadd.f32 %v65_v34, %v64_v30  ;;  %v72_v38 = vadd.f32 %v71_v36, %v70_v32 }
  0x1e   :  { %299 = vrsqrt.f32 %v54_v33  ;;  %vm75_vm0 = vcmp.eq.f32.partialorder %v54_v33, inf  ;;  %v78_v45 = vand.u32 2147483648, %v54_v33  ;;  %vm77_vm2 = vcmp.eq.f32.partialorder %v54_v33, 0.0 }
  0x1f   :  { %301 = vrsqrt.f32 %v60_v35  ;;  %vm82_vm1 = vcmp.eq.f32.partialorder %v60_v35, inf  ;;  %v85_v47 = vand.u32 2147483648, %v60_v35  ;;  %vm84_vm3 = vcmp.eq.f32.partialorder %v60_v35, 0.0 }
  0x20   :  { %303 = vrsqrt.f32 %v66_v37  ;;  %vm89_vm4 = vcmp.eq.f32.partialorder %v66_v37, inf  ;;  %vm96_vm5 = vcmp.eq.f32.partialorder %v72_v38, inf  ;;  %v92_v52 = vand.u32 2147483648, %v66_v37 }
  0x21   :  { %297 = vset.pattern.permute.xlu1 %v380_v6  ;;  %298 = vset.pattern.permute.xlu0 %v380_v6  ;;  %305 = vrsqrt.f32 %v72_v38  ;;  %vm91_vm6 = vcmp.eq.f32.partialorder %v66_v37, 0.0  ;;  %v99_v55 = vand.u32 2147483648, %v72_v38  ;;  %vm98_vm7 = vcmp.eq.f32.partialorder %v72_v38, 0.0 }
  0x22   :  { %174 = vperm.xlu1 %297, %v41_v2   ;;  %178 = vperm.xlu0 %298, %v42_v4   ;;  %v434_v2 = vld [vmem:[#allocation2 + $0x8] sm:$0xff]  ;;  %v438_v4 = vld [vmem:[#allocation2 + $0x18] sm:$0xff] }
  0x26   :  { %182 = vperm.xlu1 %297, %v43_v1   ;;  %v432_v1 = vld [vmem:[#allocation2] sm:$0xff] }
  0x2a   :  { %186 = vperm.xlu1 %297, %v44_v3   ;;  %v436_v3 = vld [vmem:[#allocation2 + $0x10] sm:$0xff] }
  0x2b   :  { %v300_v39 = vpop.eup %299 }
  0x2c   :  { %v302_v40 = vpop.eup %301  ;;  %v74_v41 = vmul.f32 %v300_v39, %v54_v33 }
  0x2d   :  { %v304_v42 = vpop.eup %303  ;;  %v81_v43 = vmul.f32 %v302_v40, %v60_v35 }
  0x2e   :  { %v306_v44 = vpop.eup %305  ;;  %v76_v46 = vsel %vm75_vm0, %v54_v33, %v74_v41  ;;  %v88_v48 = vmul.f32 %v304_v42, %v66_v37 }
  0x2f   :  { %v83_v49 = vsel %vm82_vm1, %v60_v35, %v81_v43  ;;  %v95_v50 = vmul.f32 %v306_v44, %v72_v38  ;;  %v79_v51 = vsel %vm77_vm2, %v78_v45, %v76_v46 }
  0x30   :  { %v86_v53 = vsel %vm84_vm3, %v85_v47, %v83_v49  ;;  %v90_v54 = vsel %vm89_vm4, %v66_v37, %v88_v48  ;;  %v101_v57 = vadd.f32 1e-08, %v79_v51 }
  0x31   :  { %v97_v56 = vsel %vm96_vm5, %v72_v38, %v95_v50  ;;  %v102_v58 = vadd.f32 1e-08, %v86_v53  ;;  %v93_v59 = vsel %vm91_vm6, %v92_v52, %v90_v54 }
  0x32   :  { %v100_v60 = vsel %vm98_vm7, %v99_v55, %v97_v56  ;;  %307 = vrcp.f32 %v101_v57  ;;  %v103_v61 = vadd.f32 1e-08, %v93_v59 }
  0x33   :  { %309 = vrcp.f32 %v102_v58  ;;  %v104_v62 = vadd.f32 1e-08, %v100_v60 }
  0x34   :  { %311 = vrcp.f32 %v103_v61 }
  0x35   :  { %313 = vrcp.f32 %v104_v62 }
  0x3f   :  { %v308_v5 = vpop.eup %307 }
  0x40   :  { %v310_v10 = vpop.eup %309 }
  0x41   :  { %v312_v19 = vpop.eup %311 }
  0x42   :  { %v314_v24 = vpop.eup %313 }
  0x8b   :  { %v126_v63 = vpop.permute.xlu1 %125  ;;  %v116_v0 = vpop.permute.xlu0 %115 }
  0x8c   :  { %v133_v6 = vmul.f32 %v116_v0, %v432_v1  ;;  %v134_v7 = vmul.f32 %v116_v0, %v434_v2  ;;  %v137_v20 = vmul.f32 %v126_v63, %v442_v11  ;;  %v138_v21 = vmul.f32 %v126_v63, %v444_v12 }
  0x8e   :  { %v141_v22 = vmul.f32 %v308_v5, %v133_v6  ;;  %v142_v23 = vmul.f32 %v310_v10, %v134_v7  ;;  %v145_v35 = vmul.f32 %v312_v19, %v137_v20  ;;  %v146_v36 = vmul.f32 %v314_v24, %v138_v21 }
  0x8f   :  { %v131_v8 = vpop.permute.xlu1 %130  ;;  %v121_v9 = vpop.permute.xlu0 %120 }
  0x90   :  { %v135_v13 = vmul.f32 %v121_v9, %v436_v3  ;;  %v136_v14 = vmul.f32 %v121_v9, %v438_v4  ;;  %v139_v25 = vmul.f32 %v131_v8, %v448_v15  ;;  %v140_v26 = vmul.f32 %v131_v8, %v450_v16 }
  0x92   :  { %v143_v17 = vmul.f32 %v308_v5, %v135_v13  ;;  %v144_v18 = vmul.f32 %v310_v10, %v136_v14  ;;  %v147_v41 = vmul.f32 %v312_v19, %v139_v25  ;;  %v148_v42 = vmul.f32 %v314_v24, %v140_v26 }
  0x94   :  { %v155_v27 = vpop.permute.xlu1 %154  ;;  %v151_v28 = vpop.permute.xlu0 %150 }
  0x95   :  { %v456_v29 = vadd.f32 %v155_v27, %v143_v17  ;;  %v458_v30 = vadd.f32 %v155_v27, %v144_v18  ;;  %v460_v31 = vadd.f32 %v151_v28, %v141_v22  ;;  %v462_v32 = vadd.f32 %v151_v28, %v142_v23 }
  0x97   :  { %v199_v33 = vmin.f32 %v456_v29, 0.0  ;;  %v200_v34 = vmin.f32 %v458_v30, 0.0  ;;  %v197_v37 = vmin.f32 %v460_v31, 0.0  ;;  %v198_v38 = vmin.f32 %v462_v32, 0.0 }
  0x98   :  { %v159_v39 = vpop.permute.xlu1 %158  ;;  %v163_v40 = vpop.permute.xlu0 %162  ;;  %vm247_vm8 = vcmp.lt.f32.partialorder %v456_v29, 0.0  ;;  %vm248_vm9 = vcmp.lt.f32.partialorder %v458_v30, 0.0  ;;  %vm245_vm10 = vcmp.lt.f32.partialorder %v460_v31, 0.0  ;;  %v229_v6 = vmul.f32 %v460_v31, %v432_v1 }
  0x99   :  { %v209_v43 = vmul.f32 1.442695, %v199_v33  ;;  %v211_v44 = vmul.f32 1.442695, %v200_v34  ;;  %v468_v45 = vadd.f32 %v159_v39, %v145_v35  ;;  %v470_v46 = vadd.f32 %v159_v39, %v146_v36 }
  0x9a   :  { %v205_v47 = vmul.f32 1.442695, %v197_v37  ;;  %v207_v48 = vmul.f32 1.442695, %v198_v38  ;;  %v472_v49 = vadd.f32 %v163_v40, %v147_v41  ;;  %v474_v50 = vadd.f32 %v163_v40, %v148_v42 }
  0x9b   :  { %315 = vpow2.f32 %v209_v43  ;;  %v201_v51 = vmin.f32 %v468_v45, 0.0  ;;  %v202_v52 = vmin.f32 %v470_v46, 0.0  ;;  %v231_v7 = vmul.f32 %v456_v29, %v436_v3 }
  0x9c   :  { %317 = vpow2.f32 %v211_v44  ;;  %v203_v53 = vmin.f32 %v472_v49, 0.0  ;;  %v204_v54 = vmin.f32 %v474_v50, 0.0  ;;  %vm246_vm11 = vcmp.lt.f32.partialorder %v462_v32, 0.0 }
  0x9d   :  { %319 = vpow2.f32 %v205_v47  ;;  %v213_v55 = vmul.f32 1.442695, %v201_v51  ;;  %v215_v56 = vmul.f32 1.442695, %v202_v52  ;;  %v175_v57 = vpop.permute.xlu1 %174  ;;  %v179_v60 = vpop.permute.xlu0 %178  ;;  %vm249_vm12 = vcmp.lt.f32.partialorder %v468_v45, 0.0 }
  0x9e   :  { %321 = vpow2.f32 %v207_v48  ;;  %v217_v58 = vmul.f32 1.442695, %v203_v53  ;;  %v219_v59 = vmul.f32 1.442695, %v204_v54  ;;  %v189_v62 = vmul.f32 %v175_v57, %v432_v1 }
  0x9f   :  { %323 = vpow2.f32 %v213_v55  ;;  %v191_v63 = vmul.f32 %v179_v60, %v436_v3  ;;  %v190_v0 = vmul.f32 %v175_v57, %v434_v2  ;;  %v192_v5 = vmul.f32 %v179_v60, %v438_v4 }
  0xa0   :  { %325 = vpow2.f32 %v215_v56  ;;  %v230_v9 = vmul.f32 %v462_v32, %v434_v2  ;;  %v232_v10 = vmul.f32 %v458_v30, %v438_v4  ;;  %v237_v17 = vadd.f32 %v229_v6, %v189_v62 }
  0xa1   :  { %327 = vpow2.f32 %v217_v58  ;;  %v183_v61 = vpop.permute.xlu1 %182  ;;  %v239_v19 = vadd.f32 %v231_v7, %v191_v63  ;;  %v233_v4 = vmul.f32 %v468_v45, %v442_v11  ;;  %v234_v34 = vmul.f32 %v470_v46, %v444_v12 }
  0xa2   :  { %329 = vpow2.f32 %v219_v59  ;;  %v193_v1 = vmul.f32 %v183_v61, %v442_v11  ;;  %v238_v3 = vadd.f32 %v230_v9, %v190_v0  ;;  %v240_v22 = vadd.f32 %v232_v10, %v192_v5 }
  0xa3   :  { %v194_v23 = vmul.f32 %v183_v61, %v444_v12  ;;  %v235_v38 = vmul.f32 %v472_v49, %v448_v15  ;;  %v236_v12 = vmul.f32 %v474_v50, %v450_v16  ;;  %vm250_vm13 = vcmp.lt.f32.partialorder %v470_v46, 0.0 }
  0xa4   :  { %v241_v11 = vadd.f32 %v233_v4, %v193_v1  ;;  %vm251_vm14 = vcmp.lt.f32.partialorder %v472_v49, 0.0  ;;  %vm252_vm15 = vcmp.lt.f32.partialorder %v474_v50, 0.0 }
  0xa5   :  { %v187_v13 = vpop.permute.xlu1 %186  ;;  %v242_v41 = vadd.f32 %v234_v34, %v194_v23 }
  0xa6   :  { %v195_v26 = vmul.f32 %v187_v13, %v448_v15  ;;  %v196_v35 = vmul.f32 %v187_v13, %v450_v16 }
  0xa8   :  { %v316_v8 = vpop.eup %315  ;;  %v243_v43 = vadd.f32 %v235_v38, %v195_v26  ;;  %v244_v47 = vadd.f32 %v236_v12, %v196_v35 }
  0xa9   :  { %v318_v14 = vpop.eup %317  ;;  %v223_v18 = vmul.f32 %v316_v8, %v191_v63 }
  0xaa   :  { %v320_v20 = vpop.eup %319  ;;  %v224_v21 = vmul.f32 %v318_v14, %v192_v5 }
  0xab   :  { %v322_v24 = vpop.eup %321  ;;  %v221_v25 = vmul.f32 %v320_v20, %v189_v62  ;;  %v255_v2 = vsel %vm247_vm8, %v223_v18, %v239_v19 }
  0xac   :  { %v324_v27 = vpop.eup %323  ;;  %v222_v28 = vmul.f32 %v322_v24, %v190_v0  ;;  %v256_v33 = vsel %vm248_vm9, %v224_v21, %v240_v22  ;;  %263 = vst [vmem:[#allocation5 + $0x10] sm:$0xff] %v255_v2 }
  0xad   :  { %v326_v36 = vpop.eup %325  ;;  %v253_v29 = vsel %vm245_vm10, %v221_v25, %v237_v17  ;;  %264 = vst [vmem:[#allocation5 + $0x18] sm:$0xff] %v256_v33  ;;  %v225_v37 = vmul.f32 %v324_v27, %v193_v1 }
  0xae   :  { %v328_v39 = vpop.eup %327  ;;  %v254_v30 = vsel %vm246_vm11, %v222_v28, %v238_v3  ;;  %261 = vst [vmem:[#allocation5] sm:$0xff] %v253_v29  ;;  %v226_v40 = vmul.f32 %v326_v36, %v194_v23 }
  0xaf   :  { %v330_v31 = vpop.eup %329  ;;  %262 = vst [vmem:[#allocation5 + $0x8] sm:$0xff] %v254_v30  ;;  %v257_v42 = vsel %vm249_vm12, %v225_v37, %v241_v11  ;;  %v227_v15 = vmul.f32 %v328_v39, %v195_v26 }
  0xb0   :  { %v258_v32 = vsel %vm250_vm13, %v226_v40, %v242_v41  ;;  %265 = vst [vmem:[#allocation5 + $0x20] sm:$0xff] %v257_v42  ;;  %v228_v44 = vmul.f32 %v330_v31, %v196_v35 }
  0xb1   :  { %266 = vst [vmem:[#allocation5 + $0x28] sm:$0xff] %v258_v32  ;;  %v259_v16 = vsel %vm251_vm14, %v227_v15, %v243_v43 }
  0xb2   :  { %v260_v48 = vsel %vm252_vm15, %v228_v44, %v244_v47  ;;  %267 = vst [vmem:[#allocation5 + $0x30] sm:$0xff] %v259_v16 }
  0xb3   :  { %268 = vst [vmem:[#allocation5 + $0x38] sm:$0xff] %v260_v48 }
  0xb4   :  { %362 = shalt.err (!%p359_p9)
}
  0xb5   :  { %280 = dma.vmem_to_hbm [thread:$0]  %s275_s6, 1024, %s531_s3, [#allocation4], %s376_s15, %s376_s15, %s377_s16  }
  0xb6   :  { %373 = dma.done.wait [#allocation4], 1024  }
  0xb7   :  { %374 = vsyncadd [#allocation4], 4294966272 }
  0xb8   :  { %284 = vsyncpa [#allocation3], 1 }
  0xb9   :  { %285 = vsyncpa [#allocation4], 1 }

</bundles_post_ra>
